<compile_context>
chip_gen: v7x
topology: tpu7x:2x2x1
jax: 0.10.0
libtpu: 0.0.40
codegen_flags: <defaults>
</compile_context>

<pallas_src>
import jax
import jax.numpy as jnp
from jax import lax
from jax.experimental import pallas as pl
from jax.experimental.pallas import tpu as pltpu


def unimodal_head_kernel(x_ref, w1_ref, b1_ref, w2_ref, b2_ref, tri_ref, o_ref):
    # In-kernel bf16 cast of x (f32 arrives straight from HBM; cast is free
    # VPU work hidden under the DMA).
    x = x_ref[...].astype(jnp.bfloat16)
    # hidden = relu(x @ W1 + b1)   (bf16 MXU operands, f32 accumulation)
    h = jnp.dot(x, w1_ref[...], preferred_element_type=jnp.float32) + b1_ref[...]
    h = jnp.maximum(h, 0.0).astype(jnp.bfloat16)
    # eta = h @ W2 + b2
    eta = jnp.dot(h, w2_ref[...], preferred_element_type=jnp.float32) + b2_ref[...]
    # v >= 0, so r = cumsum(v) >= 0 and -|r| == -r; the negation is folded into
    # neg_tri (neg_tri[i,j] = -(i <= j)).  Do NOT remove the abs on eta without
    # revisiting that identity.  v stays f32 — no bf16 round-trip needed.
    v = jnp.abs(eta)
    # z = v @ neg_tri  ==  -cumsum(v, axis=1)
    o_ref[...] = jnp.dot(v, tri_ref[...],
                         preferred_element_type=jnp.float32).astype(o_ref.dtype)


def _round_up(x, m):
    return ((x + m - 1) // m) * m


def unimodal_head(x, w1, b1, w2, b2, *, tile_b=4096, out_dtype=jnp.float32):
    """x: (B, D_in); w1: (D_in, H); b1: (1, H); w2: (H, C); b2: (1, C)."""
    B, D_in = x.shape
    H = w1.shape[1]
    C = w2.shape[1]

    # Big batch tile to amortize per-grid-step overhead; clamp to the padded
    # batch for small problems.  Even at tile_b=4096 the double-buffered
    # x + out blocks are < 1.5 MiB, far inside the scoped VMEM limit on every
    # generation (v5e/v6e/v7x).
    padded_b = max(8, _round_up(B, 8))
    tile_b = min(tile_b, padded_b)
    # Cap so the grid has >= 2 steps whenever B allows it, so v7x's 2nd
    # TensorCore gets work via the "parallel" batch axis (no-op on v5e/v6e).
    two_tile_cap = max(8, _round_up(pl.cdiv(B, 2), 8))
    tile_b = min(tile_b, two_tile_cap)
    grid = (pl.cdiv(B, tile_b),)

    # bf16 MXU operands for the (tiny, VMEM-resident) weights; biases stay f32
    # for the post-accumulation add.  x intentionally stays f32 (cast in-kernel).
    w1_bf = w1.astype(jnp.bfloat16)
    w2_bf = w2.astype(jnp.bfloat16)
    b1_f = b1.astype(jnp.float32)
    b2_f = b2.astype(jnp.float32)

    # Negated lower-triangular cumsum matrix, built once, exact in f32.
    row = lax.broadcasted_iota(jnp.int32, (C, C), 0)
    col = lax.broadcasted_iota(jnp.int32, (C, C), 1)
    neg_tri = jnp.where(row <= col, -1.0, 0.0).astype(jnp.float32)

    flops = 2 * B * (D_in * H + H * C + C * C)
    out_bytes = jnp.dtype(out_dtype).itemsize
    bytes_accessed = (x.size * x.dtype.itemsize
                      + w1_bf.size * 2 + w2_bf.size * 2
                      + b1_f.size * 4 + b2_f.size * 4
                      + neg_tri.size * 4 + B * C * out_bytes)

    return pl.pallas_call(
        unimodal_head_kernel,
        out_shape=jax.ShapeDtypeStruct((B, C), out_dtype),
        grid=grid,
        in_specs=[
            # batch-tiled activation (f32 straight from HBM)
            pl.BlockSpec((tile_b, D_in), lambda i: (i, 0)),
            # weights / biases / tri: constant index_map -> resident in VMEM
            pl.BlockSpec((D_in, H), lambda i: (0, 0)),
            pl.BlockSpec((1, H), lambda i: (0, 0)),
            pl.BlockSpec((H, C), lambda i: (0, 0)),
            pl.BlockSpec((1, C), lambda i: (0, 0)),
            pl.BlockSpec((C, C), lambda i: (0, 0)),
        ],
        out_specs=pl.BlockSpec((tile_b, C), lambda i: (i, 0)),
        compiler_params=pltpu.CompilerParams(
            dimension_semantics=("parallel",),       # megacore sharding on v7x
            vmem_limit_bytes=32 * 1024 * 1024,       # explicit, generation-safe
        ),
        cost_estimate=pl.CostEstimate(
            flops=flops, transcendentals=0, bytes_accessed=bytes_accessed),
    )(x, w1_bf, b1_f, w2_bf, b2_f, neg_tri)


def reference(x, w1, b1, w2, b2):
    h = jnp.maximum(x @ w1 + b1, 0.0)
    eta = h @ w2 + b2
    v = jnp.abs(eta)
    r = jnp.cumsum(v, axis=1)
    return -jnp.abs(r)


if __name__ == "__main__":
    # Small shapes consistent with the module's forward (x is (batch, input_dim)).
    batch, input_dim, hidden_dim, num_classes = 8, 16, 32, 6

    key = jax.random.PRNGKey(0)
    kx, k1, kb1, k2, kb2 = jax.random.split(key, 5)

    x = jax.random.normal(kx, (batch, input_dim), dtype=jnp.float32)
    # nn.Linear params, stored pre-transposed as (in_features, out_features).
    w1 = jax.random.normal(k1, (input_dim, hidden_dim), dtype=jnp.float32) * 0.1
    b1 = jax.random.normal(kb1, (1, hidden_dim), dtype=jnp.float32) * 0.1
    w2 = jax.random.normal(k2, (hidden_dim, num_classes), dtype=jnp.float32) * 0.1
    b2 = jax.random.normal(kb2, (1, num_classes), dtype=jnp.float32) * 0.1

    z = unimodal_head(x, w1, b1, w2, b2)
    jax.block_until_ready(z)

    z_ref = reference(x, w1, b1, w2, b2)
    assert z.shape == (batch, num_classes)
    # bf16 MXU operands (f32 accumulation) -> slightly wider tolerance vs the
    # pure-f32 reference.
    assert jnp.allclose(z, z_ref, atol=2e-2, rtol=2e-2), "mismatch vs reference"

    print("KERNEL_OK")
</pallas_src>

<mosaic_0001>
module attributes {stable_mosaic.version = 11 : i64} {
  func.func @unimodal_head_kernel(%arg0: i32, %arg1: memref<8x16xf32, #tpu.memory_space<vmem>>, %arg2: memref<16x32xbf16, #tpu.memory_space<vmem>>, %arg3: memref<1x32xf32, #tpu.memory_space<vmem>>, %arg4: memref<32x6xbf16, #tpu.memory_space<vmem>>, %arg5: memref<1x6xf32, #tpu.memory_space<vmem>>, %arg6: memref<6x6xf32, #tpu.memory_space<vmem>>, %arg7: memref<8x6xf32, #tpu.memory_space<vmem>>) attributes {dimension_semantics = [#tpu.dimension_semantics<parallel>], iteration_bounds = array<i64: 1>, scalar_prefetch = 0 : i64, scratch_operands = 0 : i64, tpu.core_type = #tpu.core_type<tc>, window_params = [{transform_indices = @transform_0, window_bounds = array<i64: 8, 16>}, {pipeline_mode = #tpu.pipeline_mode<synchronous>, transform_indices = @transform_1, window_bounds = array<i64: 16, 32>}, {pipeline_mode = #tpu.pipeline_mode<synchronous>, transform_indices = @transform_2, window_bounds = array<i64: 1, 32>}, {pipeline_mode = #tpu.pipeline_mode<synchronous>, transform_indices = @transform_3, window_bounds = array<i64: 32, 6>}, {pipeline_mode = #tpu.pipeline_mode<synchronous>, transform_indices = @transform_4, window_bounds = array<i64: 1, 6>}, {pipeline_mode = #tpu.pipeline_mode<synchronous>, transform_indices = @transform_5, window_bounds = array<i64: 6, 6>}, {transform_indices = @transform_6, window_bounds = array<i64: 8, 6>}]} {
    %c0 = arith.constant 0 : index
    %c0_0 = arith.constant 0 : index
    %0 = vector.load %arg1[%c0, %c0_0] : memref<8x16xf32, #tpu.memory_space<vmem>>, vector<8x16xf32>
    %1 = arith.truncf %0 : vector<8x16xf32> to vector<8x16xbf16>
    %c0_1 = arith.constant 0 : index
    %c0_2 = arith.constant 0 : index
    %2 = vector.load %arg2[%c0_1, %c0_2] : memref<16x32xbf16, #tpu.memory_space<vmem>>, vector<16x32xbf16>
    %cst = arith.constant dense<0.000000e+00> : vector<8x32xf32>
    %3 = tpu.matmul %1, %2, %cst {dimension_numbers = #tpu.dot_dimension_numbers<[1], [0], [0], [1], [0, 0, 1, 1], [], []>} : vector<8x16xbf16>, vector<16x32xbf16>, vector<8x32xf32> -> vector<8x32xf32>
    %c0_3 = arith.constant 0 : index
    %c0_4 = arith.constant 0 : index
    %4 = vector.load %arg3[%c0_3, %c0_4] : memref<1x32xf32, #tpu.memory_space<vmem>>, vector<1x32xf32>
    %5 = vector.broadcast %4 : vector<1x32xf32> to vector<8x32xf32>
    %6 = arith.addf %3, %5 : vector<8x32xf32>
    %cst_5 = arith.constant 0.000000e+00 : f32
    %7 = vector.broadcast %cst_5 : f32 to vector<8x32xf32>
    %8 = arith.maximumf %6, %7 : vector<8x32xf32>
    %9 = arith.truncf %8 : vector<8x32xf32> to vector<8x32xbf16>
    %c0_6 = arith.constant 0 : index
    %c0_7 = arith.constant 0 : index
    %10 = vector.load %arg4[%c0_6, %c0_7] : memref<32x6xbf16, #tpu.memory_space<vmem>>, vector<32x6xbf16>
    %cst_8 = arith.constant dense<0.000000e+00> : vector<8x6xf32>
    %11 = tpu.matmul %9, %10, %cst_8 {dimension_numbers = #tpu.dot_dimension_numbers<[1], [0], [0], [1], [0, 0, 1, 1], [], []>} : vector<8x32xbf16>, vector<32x6xbf16>, vector<8x6xf32> -> vector<8x6xf32>
    %c0_9 = arith.constant 0 : index
    %c0_10 = arith.constant 0 : index
    %12 = vector.load %arg5[%c0_9, %c0_10] : memref<1x6xf32, #tpu.memory_space<vmem>>, vector<1x6xf32>
    %13 = vector.broadcast %12 : vector<1x6xf32> to vector<8x6xf32>
    %14 = arith.addf %11, %13 : vector<8x6xf32>
    %15 = math.absf %14 : vector<8x6xf32>
    %c0_11 = arith.constant 0 : index
    %c0_12 = arith.constant 0 : index
    %16 = vector.load %arg6[%c0_11, %c0_12] : memref<6x6xf32, #tpu.memory_space<vmem>>, vector<6x6xf32>
    %cst_13 = arith.constant dense<0.000000e+00> : vector<8x6xf32>
    %17 = tpu.matmul %15, %16, %cst_13 {dimension_numbers = #tpu.dot_dimension_numbers<[1], [0], [0], [1], [0, 0, 1, 1], [], []>} : vector<8x6xf32>, vector<6x6xf32>, vector<8x6xf32> -> vector<8x6xf32>
    %c0_14 = arith.constant 0 : index
    %c0_15 = arith.constant 0 : index
    %18 = vector.load %arg7[%c0_14, %c0_15] : memref<8x6xf32, #tpu.memory_space<vmem>>, vector<8x6xf32>
    tpu.vector_store %arg7[%c0_14, %c0_15], %17 {strides = array<i32>} : memref<8x6xf32, #tpu.memory_space<vmem>>, vector<8x6xf32>,
    return
  }
  func.func @transform_0(%arg0: i32) -> (i32, i32) {
    %c0_i32 = arith.constant 0 : i32
    %c0_i32_0 = arith.constant 0 : i32
    return %arg0, %c0_i32 : i32, i32
  }
  func.func @transform_1(%arg0: i32) -> (i32, i32) {
    %c0_i32 = arith.constant 0 : i32
    %c0_i32_0 = arith.constant 0 : i32
    %c0_i32_1 = arith.constant 0 : i32
    return %c0_i32, %c0_i32_0 : i32, i32
  }
  func.func @transform_2(%arg0: i32) -> (i32, i32) {
    %c0_i32 = arith.constant 0 : i32
    %c0_i32_0 = arith.constant 0 : i32
    %c0_i32_1 = arith.constant 0 : i32
    return %c0_i32, %c0_i32_0 : i32, i32
  }
  func.func @transform_3(%arg0: i32) -> (i32, i32) {
    %c0_i32 = arith.constant 0 : i32
    %c0_i32_0 = arith.constant 0 : i32
    %c0_i32_1 = arith.constant 0 : i32
    return %c0_i32, %c0_i32_0 : i32, i32
  }
  func.func @transform_4(%arg0: i32) -> (i32, i32) {
    %c0_i32 = arith.constant 0 : i32
    %c0_i32_0 = arith.constant 0 : i32
    %c0_i32_1 = arith.constant 0 : i32
    return %c0_i32, %c0_i32_0 : i32, i32
  }
  func.func @transform_5(%arg0: i32) -> (i32, i32) {
    %c0_i32 = arith.constant 0 : i32
    %c0_i32_0 = arith.constant 0 : i32
    %c0_i32_1 = arith.constant 0 : i32
    return %c0_i32, %c0_i32_0 : i32, i32
  }
  func.func @transform_6(%arg0: i32) -> (i32, i32) {
    %c0_i32 = arith.constant 0 : i32
    %c0_i32_0 = arith.constant 0 : i32
    return %arg0, %c0_i32 : i32, i32
  }
}

</mosaic_0001>

<bundles_post_ra>
// kernel: tpu_custom_call.1
= control target key start
LH: loop header
LB: loop body
LE: loop exit
PB: predicated region body
PF: predicated region fallthrough
CT: control target
= control target key end

     0   :  { %v315_v1 = vmov 0.0   ;;  %vm42_vm0 = vcmask 130048   ;;  %vm316_vm1 = vmmov 0   ;;  %s386_s0 = inlined_call_operand.vmem [shape: f32[8,16], index: 0, kind: input, shape index: {}]   ;;  %s387_s1 = inlined_call_operand.vmem [shape: bf16[16,32], index: 1, kind: input, shape index: {}]   ;;  %s388_s2 = inlined_call_operand.vmem [shape: f32[1,32], index: 2, kind: input, shape index: {}]   ;;  %s389_s3 = inlined_call_operand.vmem [shape: bf16[32,6], index: 3, kind: input, shape index: {}]   ;;  %s390_s4 = inlined_call_operand.vmem [shape: f32[1,6], index: 4, kind: input, shape index: {}]   ;;  %s391_s5 = inlined_call_operand.vmem [shape: f32[6,6], index: 5, kind: input, shape index: {}]   ;;  %s392_s6 = inlined_call_operand.hbm [shape: f32[8,6], index: 6, kind: output, shape index: {}]  }
   0x1   :  { %v288_v0 = vld [vmem:[%s387_s1] sm:$0xff]   ;;  %266 = vmatprep.subr.bf16.mxu0 %v315_v1  ;;  %272 = vmatprep.subr.bf16.mxu1 %v315_v1 }
   0x2   :  { %v25_v2 = vld [vmem:[%s386_s0] sm:$0xff]  ;;  %267 = vmatpush3.bf16.msra.mxu0 %v288_v0  ;;  %268 = vmatprep.mubr.msk.bf16.mxu0 %vm316_vm1, %v315_v1 }
   0x3   :  { %v26_v3 = vpack.c.bf16 %v25_v2, %v25_v2  ;;  %276 = vmatprep.mubr.msk.bf16.mxu1 %vm316_vm1, %v315_v1  ;;  %280 = vmatprep.subr.mxu0 %v315_v1 }
   0x4   :  { %11 = vsyncpa [#allocation3], 0  ;;  %v289_v4 = vld [vmem:[%s389_s3] sm:$0xff]   ;;  %v290_v5 = vld [vmem:[%s389_s3 + $0x8] sm:$0xff]   ;;  %vm161_vm2 = vcmask 1045504   ;;  %vm111_vm3 = vcmask 261120  }
   0x5   :  { %269 = vmatmul.mubr.msk.bf16.vlgmr.msra.gmra.mrb[0].mxu0 %vm42_vm0, %v26_v3  ;;  %273 = vmatpush3.bf16.msra.mxu1 %v289_v4  ;;  %v156_v6 = vld [vmem:[%s391_s5] sm:$0x3f]  ;;  %vm157_vm4 = vcmask 48128  }
   0x6   :  { %282 = vmatprep.mubr.msk.f32.mxu0 %vm316_vm1, %v315_v1  ;;  %274 = vmatprep.subr.bf16.mxu1 %v315_v1  ;;  %v250_v7 = vld [vmem:[%s388_s2] ss:$0 sm:$0xff]  ;;  %s317_s2 = smov [#allocation2]  }
   0x7   :  { %281 = vmatpush3.msk.msra.mxu0 %vm161_vm2, %v156_v6  ;;  %v253_v15 = vld [vmem:[%s390_s4] ss:$0 sm:$0xff]  ;;  %s242_s5 = sshll.u32 %s317_s2, 4  ;;  %s243_s5 = int_to_ptr.vmem [resolvable:$true] %s242_s5 }
   0x8   :  { %s291_s8 = scalar_lea.vmem %s243_s5, 128  ;;  %p296_p1 = scmp.lt.s32.totalorder %s243_s5, %s243_s5 }
   0x9   :  { %275 = vmatpush3.bf16.msra.mxu1 %v290_v5  ;;  %p292_p0 = scmp.ne.s32.totalorder %s243_s5, %s291_s8  ;;  %p297_p2 = scmp.lt.s32.totalorder %s291_s8, %s291_s8 }
   0xb   :  { %p298_p3 = por %p297_p2, %p296_p1 }
   0xd   :  { %p299_p4 = pnand %p298_p3, %p292_p0 }
  0xd8   :  { %v80_v8 = vpop.f32.mrb[0].mxu0 }
  0xd9   :  { %v81_v9 = vadd.f32 %v250_v7, %v80_v8  ;;  %v270_v10 = vpop.f32.mrb[1].mxu0 }
  0xda   :  { %v83_v11 = vpop.f32.mrb[2].mxu0 }
  0xdb   :  { %v86_v12 = vmax.f32 %v81_v9, 0.0  ;;  %v271_v13 = vpop.f32.mrb[3].mxu0 }
  0xdd   :  { %v87_v14 = vpack.c.bf16 %v86_v12, %v86_v12 }
  0xdf   :  { %277 = vmatmul.mubr.msk.bf16.vlgmr.msra.gmra.mrb[0].mxu1 %vm111_vm3, %v87_v14 }
 0x1b2   :  { %v149_v16 = vpop.f32.mrb[0].mxu1 }
 0x1b3   :  { %v150_v17 = vadd.f32 %v253_v15, %v149_v16  ;;  %v278_v18 = vpop.f32.mrb[1].mxu1 }
 0x1b4   :  { %v152_v19 = vpop.f32.mrb[2].mxu1 }
 0x1b5   :  { %v155_v20 = vand.u32 2147483647, %v150_v17  ;;  %v279_v21 = vpop.f32.mrb[3].mxu1 }
 0x1b7   :  { %283 = vmatmul.mubr.msk.f32.vlgmr.msra.gmra.mrb[4].mxu0 %vm157_vm4, %v155_v20 }
 0x28a   :  { %v231_v22 = vpop.f32.mrb[4].mxu0 }
 0x28b   :  { %235 = vst.msk [vmem:[#allocation2] sm:$0xff] %vm157_vm4, %v231_v22  ;;  %v284_v23 = vpop.f32.mrb[5].mxu0 }
 0x28c   :  { %302 = shalt.err (!%p299_p4)
}
 0x28d   :  { %s303_s10 = scalar_lea.hbm %s392_s6, 128 }
 0x28e   :  { %p304_p5 = scmp.ne.s32.totalorder %s392_s6, %s303_s10  ;;  %p307_p6 = scmp.lt.u32.totalorder %s303_s10, %s392_s6 }
 0x290   :  { %p309_p7 = pnand %p307_p6, %p304_p5 }
 0x292   :  { %312 = shalt.err (!%p309_p7)
}
 0x293   :  { %245 = dma.vmem_to_hbm [thread:$0]  %s243_s5, 128, %s392_s6, [#allocation3]  }
 0x294   :  { %313 = dma.done.wait [#allocation3], 128  }
 0x295   :  { %314 = vsyncadd [#allocation3], 4294967168 }
 0x296   :  { %249 = vsyncpa [#allocation3], 1 }

</bundles_post_ra>
